<compile_context>
chip_gen: v5e
topology: v5e:2x2
jax: 0.10.0
libtpu: 0.0.40
codegen_flags: <defaults>
</compile_context>

<pallas_src>
import functools

import jax
import jax.numpy as jnp
from jax.experimental import pallas as pl
from jax.experimental.pallas import tpu as pltpu


# ----------------------------- kernels -------------------------------------


def _linear_act_kernel(x_ref, w_ref, b_ref, o_ref, *, activation):
    # y = x @ W + b, then optional activation.  W is stored (in, out) so no
    # in-kernel transpose is needed.
    y = jnp.dot(x_ref[...], w_ref[...], preferred_element_type=jnp.float32)
    y = y + b_ref[...]                      # (tm, n) + (1, n) broadcast
    if activation == "relu":
        y = jnp.maximum(y, 0.0)
    elif activation == "sigmoid":
        y = jax.nn.sigmoid(y)
    o_ref[...] = y.astype(o_ref.dtype)


def _linear_noise_relu_kernel(x_ref, w_ref, b_ref, noise_ref, o_ref, *, mean, std):
    # Layer-0 training path: relu(x @ W + b + (noise * std + mean)).
    # `noise` is a pre-drawn standard normal; scale/shift/add are fused here.
    y = jnp.dot(x_ref[...], w_ref[...], preferred_element_type=jnp.float32)
    y = y + b_ref[...]
    y = y + (noise_ref[...].astype(jnp.float32) * jnp.float32(std) + jnp.float32(mean))
    o_ref[...] = jnp.maximum(y, 0.0).astype(o_ref.dtype)


# ----------------------------- wrappers ------------------------------------


def linear_pallas(x, w_t, b, *, activation, noise=None,
                  noise_mean=0.0, noise_std=0.0, block_m=256):
    """Fused Linear + (optional Gaussian-noise add) + activation.

    x:   (M, K) activations
    w_t: (K, N) weight, i.e. the transpose of the PyTorch (out, in) layout
    b:   (N,)   bias
    noise: optional (M, N) standard-normal draw (layer-0 training path only)
    """
    m, k = x.shape
    kw, n = w_t.shape
    assert k == kw, (k, kw)

    b2 = jnp.asarray(b, jnp.float32).reshape(1, n)

    # Row tiling: full extent for small batches, otherwise 256-row tiles
    # (multiple of 8 sublanes; ~1 MiB/block for these hidden sizes, well
    # inside the v7x scoped-VMEM budget even with double-buffered in+out).
    if m <= block_m:
        tm, m_pad = m, m
    else:
        tm = block_m
        m_pad = ((m + tm - 1) // tm) * tm
    pad = m_pad - m
    if pad:
        x = jnp.pad(x, ((0, pad), (0, 0)))
        if noise is not None:
            noise = jnp.pad(noise, ((0, pad), (0, 0)))

    grid = (m_pad // tm,)
    x_spec = pl.BlockSpec((tm, k), lambda i: (i, 0))
    w_spec = pl.BlockSpec((k, n), lambda i: (0, 0))
    b_spec = pl.BlockSpec((1, n), lambda i: (0, 0))
    o_spec = pl.BlockSpec((tm, n), lambda i: (i, 0))

    if noise is None:
        kernel = functools.partial(_linear_act_kernel, activation=activation)
        in_specs = [x_spec, w_spec, b_spec]
        operands = (x, w_t, b2)
    else:
        assert activation == "relu"
        kernel = functools.partial(_linear_noise_relu_kernel,
                                   mean=float(noise_mean), std=float(noise_std))
        in_specs = [x_spec, w_spec, b_spec, pl.BlockSpec((tm, n), lambda i: (i, 0))]
        operands = (x, w_t, b2, noise)

    out = pl.pallas_call(
        kernel,
        out_shape=jax.ShapeDtypeStruct((m_pad, n), x.dtype),
        grid=grid,
        in_specs=in_specs,
        out_specs=o_spec,
        compiler_params=pltpu.CompilerParams(
            dimension_semantics=("parallel",),   # shard row-tiles across TCs on v7x
        ),
    )(*operands)
    return out[:m] if pad else out


def emulator_forward(x, weights, biases, *, noise_mean=0.0, noise_std=0.0,
                     training=True, key=None):
    """Pallas implementation of Emulator.forward.

    weights[i] has shape (in_i, out_i) (transpose of the PyTorch layout);
    biases[i] has shape (out_i,).
    """
    num = len(weights)
    for i in range(num):
        w, b = weights[i], biases[i]
        last = (i == num - 1)
        if last:
            x = linear_pallas(x, w, b, activation="sigmoid")
        elif i == 0 and training and noise_std != 0.0:
            if key is None:
                key = jax.random.PRNGKey(0)
            noise = jax.random.normal(key, (x.shape[0], w.shape[1]), dtype=x.dtype)
            x = linear_pallas(x, w, b, activation="relu", noise=noise,
                              noise_mean=noise_mean, noise_std=noise_std)
        elif i == 0 and training and noise_mean != 0.0:
            # std == 0: noise degenerates to the constant `mean`; fold into bias.
            x = linear_pallas(x, w, b + jnp.float32(noise_mean), activation="relu")
        else:
            # eval mode, or std == 0 and mean == 0 (module defaults): no noise.
            x = linear_pallas(x, w, b, activation="relu")
    return x


# ----------------------------- reference & demo ----------------------------


def _emulator_reference(x, weights, biases, *, noise=None, noise_mean=0.0, noise_std=0.0):
    num = len(weights)
    for i, (w, b) in enumerate(zip(weights, biases)):
        if i < num - 1:
            y = x @ w + b
            if i == 0 and noise is not None:
                y = y + (noise * noise_std + noise_mean)
            x = jnp.maximum(y, 0.0)
        else:
            x = jax.nn.sigmoid(x @ w + b)
    return x


if __name__ == "__main__":
    root = jax.random.PRNGKey(0)
    k_x, k_w, k_noise = jax.random.split(root, 3)

    layer_sizes = [32, 64, 64, 16]
    batch = 8

    x = jax.random.normal(k_x, (batch, layer_sizes[0]), dtype=jnp.float32)

    # PyTorch-style Linear init, but stored pre-transposed as (in, out).
    weights, biases = [], []
    wkeys = jax.random.split(k_w, len(layer_sizes) - 1)
    for i in range(len(layer_sizes) - 1):
        fan_in, fan_out = layer_sizes[i], layer_sizes[i + 1]
        bound = fan_in ** -0.5
        kw_i, kb_i = jax.random.split(wkeys[i])
        weights.append(jax.random.uniform(kw_i, (fan_in, fan_out), jnp.float32, -bound, bound))
        biases.append(jax.random.uniform(kb_i, (fan_out,), jnp.float32, -bound, bound))

    # 1) Module defaults (noise_std=0): training forward must equal eval forward
    #    exactly, and both must match the pure-JAX reference.
    y_train0 = emulator_forward(x, weights, biases, noise_mean=0.0, noise_std=0.0,
                                training=True, key=k_noise)
    y_eval = emulator_forward(x, weights, biases, noise_mean=0.0, noise_std=0.5,
                              training=False)
    y_train0, y_eval = jax.block_until_ready((y_train0, y_eval))
    assert jnp.array_equal(y_train0, y_eval), "std=0 training path must equal eval path"
    y_ref0 = _emulator_reference(x, weights, biases)
    assert jnp.allclose(y_train0, y_ref0, atol=2e-2, rtol=2e-2), "mismatch vs reference (no noise)"

    # 2) Training with nonzero noise: exact same noise draw fed to the reference.
    mean, std = 0.05, 0.1
    y_noisy = emulator_forward(x, weights, biases, noise_mean=mean, noise_std=std,
                               training=True, key=k_noise)
    y_noisy = jax.block_until_ready(y_noisy)
    noise = jax.random.normal(k_noise, (batch, layer_sizes[1]), dtype=jnp.float32)
    y_ref_noisy = _emulator_reference(x, weights, biases, noise=noise,
                                      noise_mean=mean, noise_std=std)
    assert y_noisy.shape == (batch, layer_sizes[-1]) and y_noisy.dtype == x.dtype
    assert bool(jnp.all(jnp.isfinite(y_noisy)))
    assert bool(jnp.all((y_noisy > 0.0) & (y_noisy < 1.0))), "sigmoid output must be in (0, 1)"
    assert jnp.allclose(y_noisy, y_ref_noisy, atol=2e-2, rtol=2e-2), "mismatch vs reference (noisy)"
    assert float(jnp.max(jnp.abs(y_noisy - y_train0))) > 1e-6, "noise had no effect"

    print("KERNEL_OK")
</pallas_src>

<mosaic_0001>
module attributes {stable_mosaic.version = 11 : i64} {
  func.func @_linear_act_kernel(%arg0: i32, %arg1: memref<8x32xf32, #tpu.memory_space<vmem>>, %arg2: memref<32x64xf32, #tpu.memory_space<vmem>>, %arg3: memref<1x64xf32, #tpu.memory_space<vmem>>, %arg4: memref<8x64xf32, #tpu.memory_space<vmem>>) attributes {dimension_semantics = [#tpu.dimension_semantics<parallel>], iteration_bounds = array<i64: 1>, scalar_prefetch = 0 : i64, scratch_operands = 0 : i64, tpu.core_type = #tpu.core_type<tc>, window_params = [{transform_indices = @transform_0, window_bounds = array<i64: 8, 32>}, {pipeline_mode = #tpu.pipeline_mode<synchronous>, transform_indices = @transform_1, window_bounds = array<i64: 32, 64>}, {pipeline_mode = #tpu.pipeline_mode<synchronous>, transform_indices = @transform_2, window_bounds = array<i64: 1, 64>}, {transform_indices = @transform_3, window_bounds = array<i64: 8, 64>}]} {
    %c0 = arith.constant 0 : index
    %c0_0 = arith.constant 0 : index
    %0 = vector.load %arg1[%c0, %c0_0] : memref<8x32xf32, #tpu.memory_space<vmem>>, vector<8x32xf32>
    %c0_1 = arith.constant 0 : index
    %c0_2 = arith.constant 0 : index
    %1 = vector.load %arg2[%c0_1, %c0_2] : memref<32x64xf32, #tpu.memory_space<vmem>>, vector<32x64xf32>
    %cst = arith.constant dense<0.000000e+00> : vector<8x64xf32>
    %2 = tpu.matmul %0, %1, %cst {dimension_numbers = #tpu.dot_dimension_numbers<[1], [0], [0], [1], [0, 0, 1, 1], [], []>} : vector<8x32xf32>, vector<32x64xf32>, vector<8x64xf32> -> vector<8x64xf32>
    %c0_3 = arith.constant 0 : index
    %c0_4 = arith.constant 0 : index
    %3 = vector.load %arg3[%c0_3, %c0_4] : memref<1x64xf32, #tpu.memory_space<vmem>>, vector<1x64xf32>
    %4 = vector.broadcast %3 : vector<1x64xf32> to vector<8x64xf32>
    %5 = arith.addf %2, %4 : vector<8x64xf32>
    %cst_5 = arith.constant 0.000000e+00 : f32
    %6 = vector.broadcast %cst_5 : f32 to vector<8x64xf32>
    %7 = arith.maximumf %5, %6 : vector<8x64xf32>
    %c0_6 = arith.constant 0 : index
    %c0_7 = arith.constant 0 : index
    %8 = vector.load %arg4[%c0_6, %c0_7] : memref<8x64xf32, #tpu.memory_space<vmem>>, vector<8x64xf32>
    tpu.vector_store %arg4[%c0_6, %c0_7], %7 {strides = array<i32>} : memref<8x64xf32, #tpu.memory_space<vmem>>, vector<8x64xf32>,
    return
  }
  func.func @transform_0(%arg0: i32) -> (i32, i32) {
    %c0_i32 = arith.constant 0 : i32
    %c0_i32_0 = arith.constant 0 : i32
    return %arg0, %c0_i32 : i32, i32
  }
  func.func @transform_1(%arg0: i32) -> (i32, i32) {
    %c0_i32 = arith.constant 0 : i32
    %c0_i32_0 = arith.constant 0 : i32
    %c0_i32_1 = arith.constant 0 : i32
    return %c0_i32, %c0_i32_0 : i32, i32
  }
  func.func @transform_2(%arg0: i32) -> (i32, i32) {
    %c0_i32 = arith.constant 0 : i32
    %c0_i32_0 = arith.constant 0 : i32
    %c0_i32_1 = arith.constant 0 : i32
    return %c0_i32, %c0_i32_0 : i32, i32
  }
  func.func @transform_3(%arg0: i32) -> (i32, i32) {
    %c0_i32 = arith.constant 0 : i32
    %c0_i32_0 = arith.constant 0 : i32
    return %arg0, %c0_i32 : i32, i32
  }
}

</mosaic_0001>

<bundles_post_ra>
// kernel: tpu_custom_call.1
= control target key start
LH: loop header
LB: loop body
LE: loop exit
PB: predicated region body
PF: predicated region fallthrough
CT: control target
= control target key end

     0   :  { %8 = vsyncpa [#allocation3], 0  ;;  %s221_s0 = inlined_call_operand.hbm [shape: f32[8,32], index: 0, kind: input, shape index: {}]   ;;  %s222_s1 = inlined_call_operand.hbm [shape: f32[32,64], index: 1, kind: input, shape index: {}]   ;;  %s223_s2 = inlined_call_operand.vmem [shape: f32[1,64], index: 2, kind: input, shape index: {}]   ;;  %s224_s3 = inlined_call_operand.hbm [shape: f32[8,64], index: 3, kind: output, shape index: {}]  }
   0x1   :  { %9 = vsyncpa [#allocation6], 0 }
   0x2   :  { %10 = vsyncpa [#allocation4], 0  ;;  %s16_s14 = sshll.u32 %s221_s0, 4  ;;  %s184_s15 = smov [#allocation2]   ;;  %s17_s14 = int_to_ptr.hbm [resolvable:$true] %s16_s14 }
   0x3   :  { %s18_s16 = sshll.u32 %s184_s15, 4  ;;  %s26_s19 = sshll.u32 %s222_s1, 4  ;;  %s19_s16 = int_to_ptr.vmem [resolvable:$true] %s18_s16  ;;  %s27_s19 = int_to_ptr.hbm [resolvable:$true] %s26_s19 }
   0x4   :  { %21 = dma.hbm_to_vmem [thread:$0]  %s17_s14, 128, %s19_s16, [#allocation3]  }
   0x5   :  { %s185_s20 = smov [#allocation5]   ;;  %s186_s22 = smov 128  }
   0x6   :  { %s28_s21 = sshll.u32 %s185_s20, 4  ;;  %s187_s23 = smov 8   ;;  %s29_s21 = int_to_ptr.vmem [resolvable:$true] %s28_s21 }
   0x7   :  { %34 = dma.hbm_to_vmem [thread:$0]  %s27_s19, 512, %s29_s21, [#allocation6], %s186_s22, %s186_s22, %s187_s23  }
   0x8   :  { %178 = dma.done.wait [#allocation3], 128  }
   0x9   :  { %179 = vsyncadd [#allocation3], 4294967168 }
   0xa   :  { %180 = dma.done.wait [#allocation6], 512  }
   0xb   :  { %181 = vsyncadd [#allocation6], 4294966784  ;;  %v49_v0 = vld [vmem:[#allocation5 + $0x18] sm:$0xff]  ;;  %v48_v1 = vld [vmem:[#allocation5 + $0x10] sm:$0xff]  ;;  %vm54_vm0 = vcmask 261120   ;;  %s188_s24 = smov [#allocation7]  }
   0xc   :  { %70 = vmatpush.msra.mxu0 %v49_v0  ;;  %v47_v2 = vld [vmem:[#allocation5 + $0x8] sm:$0xff]  ;;  %v46_v3 = vld [vmem:[#allocation5] sm:$0xff]  ;;  %v45_v4 = vld [vmem:[#allocation2] sm:$0xff]  ;;  %s86_s25 = sshll.u32 %s188_s24, 4  ;;  %s88_s28 = sshll.u32 %s224_s3, 4  ;;  %vm79_vm1 = vcmask 523264   ;;  %s87_s25 = int_to_ptr.vmem [resolvable:$true] %s86_s25  ;;  %s89_s28 = int_to_ptr.hbm [resolvable:$true] %s88_s28 }
   0xd   :  { %v105_v5 = vld [vmem:[%s223_s2] ss:$0 sm:$0xff] }
   0xe   :  { %71 = vmatpush.msra.mxu0 %v48_v1 }
  0x10   :  { %72 = vmatpush.msra.mxu0 %v47_v2 }
  0x12   :  { %73 = vmatpush.msra.mxu0 %v46_v3 }
  0x13   :  { %99 = vmatmul.msk.f32.vlgmr.msra.gmra.mxu0 %vm54_vm0, %v45_v4 }
  0x90   :  { %v75_v6 = vpop.f32.mrf.mxu0 }
  0x91   :  { %v76_v7 = vadd.f32 %v105_v5, %v75_v6 }
  0x93   :  { %v78_v8 = vmax.f32 %v76_v7, 0.0 }
  0x95   :  { %80 = vst.msk [vmem:[#allocation7] sm:$0xff] %vm79_vm1, %v78_v8 }
  0x96   :  { %91 = dma.vmem_to_hbm [thread:$0]  %s87_s25, 128, %s89_s28, [#allocation4]  }
  0x97   :  { %182 = dma.done.wait [#allocation4], 128  }
  0x98   :  { %183 = vsyncadd [#allocation4], 4294967168 }
  0x99   :  { %96 = vsyncpa [#allocation3], 1 }
  0x9a   :  { %97 = vsyncpa [#allocation6], 1 }
  0x9b   :  { %98 = vsyncpa [#allocation4], 1 }

</bundles_post_ra>
